<compile_context>
chip_gen: v7x
topology: tpu7x:2x2x1
jax: 0.10.0
libtpu: 0.0.40
codegen_flags: <defaults>
</compile_context>

<pallas_src>
import math
import numpy as np
import jax
import jax.numpy as jnp
from jax.experimental import pallas as pl
from jax.experimental.pallas import tpu as pltpu

LRELU_SLOPE = 0.02


# ------------------------- init-time weight preparation -------------------------

def _cout_pad(cout_real, ow):
    """Pad Cout so OW*Cout_pad is lane-dense (128) when OW divides 128."""
    if ow <= 128 and 128 % ow == 0:
        return max(cout_real, 128 // ow)
    return cout_real


def _prep_stride2_weight(w_oihw, h_in, cin_pad, cout_pad):
    """Build (D_lo, D_hi) for a k=4, s=2, p=1 conv on the row-pair layout.

    Row-pair layout of the (H-padded only) input:
        buf[p, dy * h_in * cin_pad + w * cin_pad + c] = x[2p + dy - 1, w, c]
        (rows with 2p+dy-1 outside [0, h_in) are zero = H padding;
         W padding is folded into the D matrices by omission.)
    Output column order: ow * cout_pad + co.
    out[oh] = buf[oh] @ D_lo + buf[oh+1] @ D_hi      (kh in {0,1} / {2,3})
    """
    cout_r, cin_r, kh_, kw_ = (int(s) for s in w_oihw.shape)
    assert (kh_, kw_) == (4, 4)
    ow_out = h_in // 2
    k_rows = 2 * h_in * cin_pad
    n_cols = ow_out * cout_pad
    w_np = np.asarray(w_oihw, dtype=np.float32)
    d_lo = np.zeros((k_rows, n_cols), np.float32)
    d_hi = np.zeros((k_rows, n_cols), np.float32)
    for dy in range(2):
        for wu in range(h_in):                      # unpadded input column
            for c in range(cin_r):
                row = dy * h_in * cin_pad + wu * cin_pad + c
                for ow in range(ow_out):
                    kw = wu - 2 * ow + 1            # +1 accounts for left W-pad
                    if 0 <= kw < 4:
                        col = ow * cout_pad
                        d_lo[row, col:col + cout_r] = w_np[:, c, dy, kw]
                        d_hi[row, col:col + cout_r] = w_np[:, c, dy + 2, kw]
    return jnp.asarray(d_lo), jnp.asarray(d_hi)


def _prep_final_weight(w_oihw, cin_pad):
    """Conv2d(cin, 1, 4, 1, 0) over a 4x4 input -> (4, 4*cin_pad) mask for a VPU reduce."""
    cout_r, cin_r, kh_, kw_ = (int(s) for s in w_oihw.shape)
    assert cout_r == 1 and (kh_, kw_) == (4, 4)
    w_np = np.asarray(w_oihw, dtype=np.float32)
    w3 = np.zeros((4, 4 * cin_pad), np.float32)
    for kh in range(4):
        for kw in range(4):
            w3[kh, kw * cin_pad:kw * cin_pad + cin_r] = w_np[0, :, kh, kw]
    return jnp.asarray(w3)


def init_critic_params(settings, key):
    """DCGAN-style N(0, 0.02) init, PyTorch OIHW layout (used for the reference too)."""
    nch, nf, imsize = settings["nchannels"], settings["nfeatures"], settings["image_size"]
    params = []
    k0, key = jax.random.split(key)
    params.append(0.02 * jax.random.normal(k0, (nf, nch, 4, 4), jnp.float32))
    mult = 1
    for _ in range(int(math.log2(imsize)) - 3):
        k, key = jax.random.split(key)
        params.append(0.02 * jax.random.normal(k, (nf * mult * 2, nf * mult, 4, 4), jnp.float32))
        mult *= 2
        # gp_enabled=True -> no BatchNorm2d in this config.
    k, key = jax.random.split(key)
    params.append(0.02 * jax.random.normal(k, (1, nf * mult, 4, 4), jnp.float32))
    return params


def prep_critic_weights(settings, params):
    """One-time weight prep (hoisted out of the forward pass)."""
    imsize, nch = settings["image_size"], settings["nchannels"]
    n_s2 = len(params) - 1                      # number of stride-2 convs
    layers, mats = [], []
    h, cin_pad = imsize, nch
    for li in range(n_s2):
        w = params[li]
        cout_r = int(w.shape[0])
        ow_out = h // 2
        cpad = _cout_pad(cout_r, ow_out)
        d_lo, d_hi = _prep_stride2_weight(w, h, cin_pad, cpad)
        layers.append(dict(h_in=h, oh=h // 2, ow=ow_out, cin_pad=cin_pad, cout_pad=cpad))
        mats.extend([d_lo, d_hi])
        h //= 2
        cin_pad = cpad
    assert h == 4, "final conv of this architecture expects a 4x4 spatial input"
    mats.append(_prep_final_weight(params[-1], cin_pad))
    return layers, mats


# --------------------------------- fused kernel ---------------------------------

def _make_fused_kernel(batch, layers):
    n_layers = len(layers)

    def kernel(*refs):
        xp_ref = refs[0]
        d_refs = [(refs[1 + 2 * i], refs[2 + 2 * i]) for i in range(n_layers)]
        w3_ref = refs[1 + 2 * n_layers]
        out_ref = refs[2 + 2 * n_layers]
        buf_refs = list(refs[3 + 2 * n_layers:])          # one VMEM buffer per layer >= 1

        # Zero pair-layout buffers once: the rows/lanes never written below are the
        # H-padding and stay zero for every image.
        for b in buf_refs:
            b[...] = jnp.zeros_like(b)

        d_mats = [(lo[...], hi[...]) for (lo, hi) in d_refs]
        w3 = w3_ref[...]

        for n in range(batch):                            # static unroll (batch=2)
            a = None
            for li, geo in enumerate(layers):
                oh, ow, cpad = geo["oh"], geo["ow"], geo["cout_pad"]
                d_lo, d_hi = d_mats[li]
                if li == 0:
                    lo = xp_ref[n, 0:oh, :]
                    hi = xp_ref[n, 1:oh + 1, :]
                else:
                    lo = buf_refs[li - 1][0:oh, :]
                    hi = buf_refs[li - 1][1:oh + 1, :]
                # k=4 / s=2 / p=1 conv == two MXU matmuls on the row-pair layout.
                a = (jnp.dot(lo, d_lo, preferred_element_type=jnp.float32)
                     + jnp.dot(hi, d_hi, preferred_element_type=jnp.float32))
                a = jnp.where(a >= 0, a, LRELU_SLOPE * a)          # LeakyReLU(0.02)
                if li + 1 < n_layers:
                    # Scatter output rows into the next layer's row-pair buffer.
                    # Each write is a lane-aligned 128-wide slab (static indices).
                    nxt = buf_refs[li]
                    row_w = ow * cpad
                    for r in range(oh):
                        p = r + 1                                   # H-padded row index
                        pair, dy = p // 2, p % 2
                        off = dy * row_w
                        nxt[pair:pair + 1, off:off + row_w] = a[r:r + 1, :]
            # Final Conv2d(cin, 1, 4, 1, 0): elementwise multiply + reduce (VPU/XLU),
            # instead of an N=1 MXU matmul with a 1-lane masked store.
            t = jnp.sum(a * w3, axis=1, keepdims=True)              # (4, 1)
            s = jnp.sum(t, axis=0, keepdims=True)                   # (1, 1)
            out_ref[n:n + 1, :] = s

    return kernel


# ------------------------------------ forward -----------------------------------

def _zero_map(ndim):
    return lambda i: (0,) * ndim


def _input_to_pairs(x_nchw):
    """NCHW -> NHWC, H-pad by 1, collapse to row-pair layout (N, (H+2)//2, 2*W*C)."""
    n, c, h, w = x_nchw.shape
    x = jnp.transpose(x_nchw, (0, 2, 3, 1))
    x = jnp.pad(x, ((0, 0), (1, 1), (0, 0), (0, 0)))
    return x.reshape(n, (h + 2) // 2, 2 * w * c)


def critic_forward(settings, prepped, x_nchw):
    """Forward pass matching CriticArchitecture.forward; input/output are NCHW."""
    layers, mats = prepped
    batch = x_nchw.shape[0]
    xpairs = _input_to_pairs(x_nchw)
    inputs = [xpairs] + list(mats)
    in_specs = [pl.BlockSpec(a.shape, _zero_map(a.ndim)) for a in inputs]
    scratch = [
        pltpu.VMEM(((g["h_in"] + 2) // 2, 2 * g["h_in"] * g["cin_pad"]), jnp.float32)
        for g in layers[1:]
    ]
    out = pl.pallas_call(
        _make_fused_kernel(batch, layers),
        out_shape=jax.ShapeDtypeStruct((batch, 1), jnp.float32),
        grid=(1,),
        in_specs=in_specs,
        out_specs=pl.BlockSpec((batch, 1), _zero_map(2)),
        scratch_shapes=scratch,
        compiler_params=pltpu.CompilerParams(dimension_semantics=("arbitrary",)),
    )(*inputs)
    return out.reshape(batch, 1, 1, 1)


# --------------------------- plain-JAX reference check ---------------------------

def _ref_forward(params, x_nchw):
    def conv(x, w, s, p):
        return jax.lax.conv_general_dilated(
            x, w, (s, s), ((p, p), (p, p)),
            dimension_numbers=("NCHW", "OIHW", "NCHW"))

    def lrelu(x):
        return jnp.where(x >= 0, x, LRELU_SLOPE * x)

    x = x_nchw
    for w in params[:-1]:
        x = lrelu(conv(x, w, 2, 1))
    return conv(x, params[-1], 1, 0)


if __name__ == "__main__":
    settings = {"gp_enabled": True, "image_size": 16, "nchannels": 4, "nfeatures": 8}

    key = jax.random.PRNGKey(0)
    kx, kp = jax.random.split(key)
    x = jax.random.normal(
        kx,
        (2, settings["nchannels"], settings["image_size"], settings["image_size"]),
        jnp.float32)
    params = init_critic_params(settings, kp)
    prepped = prep_critic_weights(settings, params)

    fwd = jax.jit(lambda xin: critic_forward(settings, prepped, xin))
    out = jax.block_until_ready(fwd(x))
    assert out.shape == (2, 1, 1, 1), out.shape

    ref = jax.block_until_ready(_ref_forward(params, x))
    assert jnp.allclose(out, ref, atol=1e-3, rtol=1e-3), (out, ref)

    print("KERNEL_OK")
</pallas_src>

<mosaic_0001>
module attributes {stable_mosaic.version = 11 : i64} {
  func.func @kernel(%arg0: i32, %arg1: memref<2x9x128xf32, #tpu.memory_space<vmem>>, %arg2: memref<128x128xf32, #tpu.memory_space<vmem>>, %arg3: memref<128x128xf32, #tpu.memory_space<vmem>>, %arg4: memref<256x128xf32, #tpu.memory_space<vmem>>, %arg5: memref<256x128xf32, #tpu.memory_space<vmem>>, %arg6: memref<4x128xf32, #tpu.memory_space<vmem>>, %arg7: memref<2x1xf32, #tpu.memory_space<vmem>>, %arg8: memref<5x256xf32, #tpu.memory_space<vmem>>) attributes {dimension_semantics = [#tpu.dimension_semantics<arbitrary>], iteration_bounds = array<i64: 1>, scalar_prefetch = 0 : i64, scratch_operands = 1 : i64, tpu.core_type = #tpu.core_type<tc>, window_params = [{pipeline_mode = #tpu.pipeline_mode<synchronous>, transform_indices = @transform_0, window_bounds = array<i64: 2, 9, 128>}, {pipeline_mode = #tpu.pipeline_mode<synchronous>, transform_indices = @transform_1, window_bounds = array<i64: 128, 128>}, {pipeline_mode = #tpu.pipeline_mode<synchronous>, transform_indices = @transform_2, window_bounds = array<i64: 128, 128>}, {pipeline_mode = #tpu.pipeline_mode<synchronous>, transform_indices = @transform_3, window_bounds = array<i64: 256, 128>}, {pipeline_mode = #tpu.pipeline_mode<synchronous>, transform_indices = @transform_4, window_bounds = array<i64: 256, 128>}, {pipeline_mode = #tpu.pipeline_mode<synchronous>, transform_indices = @transform_5, window_bounds = array<i64: 4, 128>}, {pipeline_mode = #tpu.pipeline_mode<synchronous>, transform_indices = @transform_6, window_bounds = array<i64: 2, 1>}]} {
    %cst = arith.constant 0.000000e+00 : f32
    %0 = vector.broadcast %cst : f32 to vector<5x256xf32>
    %c0 = arith.constant 0 : index
    %c0_0 = arith.constant 0 : index
    %1 = vector.load %arg8[%c0, %c0_0] : memref<5x256xf32, #tpu.memory_space<vmem>>, vector<5x256xf32>
    tpu.vector_store %arg8[%c0, %c0_0], %0 {strides = array<i32>} : memref<5x256xf32, #tpu.memory_space<vmem>>, vector<5x256xf32>,
    %c0_1 = arith.constant 0 : index
    %c0_2 = arith.constant 0 : index
    %2 = vector.load %arg2[%c0_1, %c0_2] : memref<128x128xf32, #tpu.memory_space<vmem>>, vector<128x128xf32>
    %c0_3 = arith.constant 0 : index
    %c0_4 = arith.constant 0 : index
    %3 = vector.load %arg3[%c0_3, %c0_4] : memref<128x128xf32, #tpu.memory_space<vmem>>, vector<128x128xf32>
    %c0_5 = arith.constant 0 : index
    %c0_6 = arith.constant 0 : index
    %4 = vector.load %arg4[%c0_5, %c0_6] : memref<256x128xf32, #tpu.memory_space<vmem>>, vector<256x128xf32>
    %c0_7 = arith.constant 0 : index
    %c0_8 = arith.constant 0 : index
    %5 = vector.load %arg5[%c0_7, %c0_8] : memref<256x128xf32, #tpu.memory_space<vmem>>, vector<256x128xf32>
    %c0_9 = arith.constant 0 : index
    %c0_10 = arith.constant 0 : index
    %6 = vector.load %arg6[%c0_9, %c0_10] : memref<4x128xf32, #tpu.memory_space<vmem>>, vector<4x128xf32>
    %c0_11 = arith.constant 0 : index
    %c0_12 = arith.constant 0 : index
    %c0_13 = arith.constant 0 : index
    %7 = vector.load %arg1[%c0_11, %c0_12, %c0_13] : memref<2x9x128xf32, #tpu.memory_space<vmem>>, vector<1x8x128xf32>
    %8 = vector.shape_cast %7 : vector<1x8x128xf32> to vector<8x128xf32>
    %c0_14 = arith.constant 0 : index
    %c1 = arith.constant 1 : index
    %c0_15 = arith.constant 0 : index
    %9 = vector.load %arg1[%c0_14, %c1, %c0_15] : memref<2x9x128xf32, #tpu.memory_space<vmem>>, vector<1x8x128xf32>
    %10 = vector.shape_cast %9 : vector<1x8x128xf32> to vector<8x128xf32>
    %cst_16 = arith.constant dense<0.000000e+00> : vector<8x128xf32>
    %11 = tpu.matmul %8, %2, %cst_16 {dimension_numbers = #tpu.dot_dimension_numbers<[1], [0], [0], [1], [0, 0, 1, 1], [], []>} : vector<8x128xf32>, vector<128x128xf32>, vector<8x128xf32> -> vector<8x128xf32>
    %cst_17 = arith.constant dense<0.000000e+00> : vector<8x128xf32>
    %12 = tpu.matmul %10, %3, %cst_17 {dimension_numbers = #tpu.dot_dimension_numbers<[1], [0], [0], [1], [0, 0, 1, 1], [], []>} : vector<8x128xf32>, vector<128x128xf32>, vector<8x128xf32> -> vector<8x128xf32>
    %13 = arith.addf %11, %12 : vector<8x128xf32>
    %cst_18 = arith.constant 0.000000e+00 : f32
    %14 = vector.broadcast %cst_18 : f32 to vector<8x128xf32>
    %15 = arith.cmpf oge, %13, %14 : vector<8x128xf32>
    %cst_19 = arith.constant 2.000000e-02 : f32
    %16 = vector.broadcast %cst_19 : f32 to vector<8x128xf32>
    %17 = arith.mulf %16, %13 : vector<8x128xf32>
    %18 = arith.select %15, %13, %17 : vector<8x128xi1>, vector<8x128xf32>
    %19 = vector.extract_strided_slice %18 {offsets = [0, 0], sizes = [1, 128], strides = [1, 1]} : vector<8x128xf32> to vector<1x128xf32>
    %c0_20 = arith.constant 0 : index
    %c128 = arith.constant 128 : index
    %20 = vector.load %arg8[%c0_20, %c128] : memref<5x256xf32, #tpu.memory_space<vmem>>, vector<1x128xf32>
    tpu.vector_store %arg8[%c0_20, %c128], %19 {strides = array<i32>} : memref<5x256xf32, #tpu.memory_space<vmem>>, vector<1x128xf32>,
    %21 = vector.extract_strided_slice %18 {offsets = [1, 0], sizes = [1, 128], strides = [1, 1]} : vector<8x128xf32> to vector<1x128xf32>
    %c1_21 = arith.constant 1 : index
    %c0_22 = arith.constant 0 : index
    %22 = vector.load %arg8[%c1_21, %c0_22] : memref<5x256xf32, #tpu.memory_space<vmem>>, vector<1x128xf32>
    tpu.vector_store %arg8[%c1_21, %c0_22], %21 {strides = array<i32>} : memref<5x256xf32, #tpu.memory_space<vmem>>, vector<1x128xf32>,
    %23 = vector.extract_strided_slice %18 {offsets = [2, 0], sizes = [1, 128], strides = [1, 1]} : vector<8x128xf32> to vector<1x128xf32>
    %c1_23 = arith.constant 1 : index
    %c128_24 = arith.constant 128 : index
    %24 = vector.load %arg8[%c1_23, %c128_24] : memref<5x256xf32, #tpu.memory_space<vmem>>, vector<1x128xf32>
    tpu.vector_store %arg8[%c1_23, %c128_24], %23 {strides = array<i32>} : memref<5x256xf32, #tpu.memory_space<vmem>>, vector<1x128xf32>,
    %25 = vector.extract_strided_slice %18 {offsets = [3, 0], sizes = [1, 128], strides = [1, 1]} : vector<8x128xf32> to vector<1x128xf32>
    %c2 = arith.constant 2 : index
    %c0_25 = arith.constant 0 : index
    %26 = vector.load %arg8[%c2, %c0_25] : memref<5x256xf32, #tpu.memory_space<vmem>>, vector<1x128xf32>
    tpu.vector_store %arg8[%c2, %c0_25], %25 {strides = array<i32>} : memref<5x256xf32, #tpu.memory_space<vmem>>, vector<1x128xf32>,
    %27 = vector.extract_strided_slice %18 {offsets = [4, 0], sizes = [1, 128], strides = [1, 1]} : vector<8x128xf32> to vector<1x128xf32>
    %c2_26 = arith.constant 2 : index
    %c128_27 = arith.constant 128 : index
    %28 = vector.load %arg8[%c2_26, %c128_27] : memref<5x256xf32, #tpu.memory_space<vmem>>, vector<1x128xf32>
    tpu.vector_store %arg8[%c2_26, %c128_27], %27 {strides = array<i32>} : memref<5x256xf32, #tpu.memory_space<vmem>>, vector<1x128xf32>,
    %29 = vector.extract_strided_slice %18 {offsets = [5, 0], sizes = [1, 128], strides = [1, 1]} : vector<8x128xf32> to vector<1x128xf32>
    %c3 = arith.constant 3 : index
    %c0_28 = arith.constant 0 : index
    %30 = vector.load %arg8[%c3, %c0_28] : memref<5x256xf32, #tpu.memory_space<vmem>>, vector<1x128xf32>
    tpu.vector_store %arg8[%c3, %c0_28], %29 {strides = array<i32>} : memref<5x256xf32, #tpu.memory_space<vmem>>, vector<1x128xf32>,
    %31 = vector.extract_strided_slice %18 {offsets = [6, 0], sizes = [1, 128], strides = [1, 1]} : vector<8x128xf32> to vector<1x128xf32>
    %c3_29 = arith.constant 3 : index
    %c128_30 = arith.constant 128 : index
    %32 = vector.load %arg8[%c3_29, %c128_30] : memref<5x256xf32, #tpu.memory_space<vmem>>, vector<1x128xf32>
    tpu.vector_store %arg8[%c3_29, %c128_30], %31 {strides = array<i32>} : memref<5x256xf32, #tpu.memory_space<vmem>>, vector<1x128xf32>,
    %33 = vector.extract_strided_slice %18 {offsets = [7, 0], sizes = [1, 128], strides = [1, 1]} : vector<8x128xf32> to vector<1x128xf32>
    %c4 = arith.constant 4 : index
    %c0_31 = arith.constant 0 : index
    %34 = vector.load %arg8[%c4, %c0_31] : memref<5x256xf32, #tpu.memory_space<vmem>>, vector<1x128xf32>
    tpu.vector_store %arg8[%c4, %c0_31], %33 {strides = array<i32>} : memref<5x256xf32, #tpu.memory_space<vmem>>, vector<1x128xf32>,
    %c0_32 = arith.constant 0 : index
    %c0_33 = arith.constant 0 : index
    %35 = vector.load %arg8[%c0_32, %c0_33] : memref<5x256xf32, #tpu.memory_space<vmem>>, vector<4x256xf32>
    %c1_34 = arith.constant 1 : index
    %c0_35 = arith.constant 0 : index
    %36 = vector.load %arg8[%c1_34, %c0_35] : memref<5x256xf32, #tpu.memory_space<vmem>>, vector<4x256xf32>
    %cst_36 = arith.constant dense<0.000000e+00> : vector<4x128xf32>
    %37 = tpu.matmul %35, %4, %cst_36 {dimension_numbers = #tpu.dot_dimension_numbers<[1], [0], [0], [1], [0, 0, 1, 1], [], []>} : vector<4x256xf32>, vector<256x128xf32>, vector<4x128xf32> -> vector<4x128xf32>
    %cst_37 = arith.constant dense<0.000000e+00> : vector<4x128xf32>
    %38 = tpu.matmul %36, %5, %cst_37 {dimension_numbers = #tpu.dot_dimension_numbers<[1], [0], [0], [1], [0, 0, 1, 1], [], []>} : vector<4x256xf32>, vector<256x128xf32>, vector<4x128xf32> -> vector<4x128xf32>
    %39 = arith.addf %37, %38 : vector<4x128xf32>
    %cst_38 = arith.constant 0.000000e+00 : f32
    %40 = vector.broadcast %cst_38 : f32 to vector<4x128xf32>
    %41 = arith.cmpf oge, %39, %40 : vector<4x128xf32>
    %cst_39 = arith.constant 2.000000e-02 : f32
    %42 = vector.broadcast %cst_39 : f32 to vector<4x128xf32>
    %43 = arith.mulf %42, %39 : vector<4x128xf32>
    %44 = arith.select %41, %39, %43 : vector<4x128xi1>, vector<4x128xf32>
    %45 = arith.mulf %44, %6 : vector<4x128xf32>
    %cst_40 = arith.constant dense<0.000000e+00> : vector<4xf32>
    %46 = vector.multi_reduction <add>, %45, %cst_40 [1] : vector<4x128xf32> to vector<4xf32>
    %47 = vector.shape_cast %46 : vector<4xf32> to vector<4x1xf32>
    %cst_41 = arith.constant dense<0.000000e+00> : vector<1xf32>
    %48 = vector.multi_reduction <add>, %47, %cst_41 [0] : vector<4x1xf32> to vector<1xf32>
    %49 = vector.shape_cast %48 : vector<1xf32> to vector<1x1xf32>
    %c0_42 = arith.constant 0 : index
    %c0_43 = arith.constant 0 : index
    %50 = vector.load %arg7[%c0_42, %c0_43] : memref<2x1xf32, #tpu.memory_space<vmem>>, vector<1x1xf32>
    tpu.vector_store %arg7[%c0_42, %c0_43], %49 {strides = array<i32>} : memref<2x1xf32, #tpu.memory_space<vmem>>, vector<1x1xf32>,
    %c1_44 = arith.constant 1 : index
    %c0_45 = arith.constant 0 : index
    %c0_46 = arith.constant 0 : index
    %51 = vector.load %arg1[%c1_44, %c0_45, %c0_46] : memref<2x9x128xf32, #tpu.memory_space<vmem>>, vector<1x8x128xf32>
    %52 = vector.shape_cast %51 : vector<1x8x128xf32> to vector<8x128xf32>
    %c1_47 = arith.constant 1 : index
    %c1_48 = arith.constant 1 : index
    %c0_49 = arith.constant 0 : index
    %53 = vector.load %arg1[%c1_47, %c1_48, %c0_49] : memref<2x9x128xf32, #tpu.memory_space<vmem>>, vector<1x8x128xf32>
    %54 = vector.shape_cast %53 : vector<1x8x128xf32> to vector<8x128xf32>
    %cst_50 = arith.constant dense<0.000000e+00> : vector<8x128xf32>
    %55 = tpu.matmul %52, %2, %cst_50 {dimension_numbers = #tpu.dot_dimension_numbers<[1], [0], [0], [1], [0, 0, 1, 1], [], []>} : vector<8x128xf32>, vector<128x128xf32>, vector<8x128xf32> -> vector<8x128xf32>
    %cst_51 = arith.constant dense<0.000000e+00> : vector<8x128xf32>
    %56 = tpu.matmul %54, %3, %cst_51 {dimension_numbers = #tpu.dot_dimension_numbers<[1], [0], [0], [1], [0, 0, 1, 1], [], []>} : vector<8x128xf32>, vector<128x128xf32>, vector<8x128xf32> -> vector<8x128xf32>
    %57 = arith.addf %55, %56 : vector<8x128xf32>
    %cst_52 = arith.constant 0.000000e+00 : f32
    %58 = vector.broadcast %cst_52 : f32 to vector<8x128xf32>
    %59 = arith.cmpf oge, %57, %58 : vector<8x128xf32>
    %cst_53 = arith.constant 2.000000e-02 : f32
    %60 = vector.broadcast %cst_53 : f32 to vector<8x128xf32>
    %61 = arith.mulf %60, %57 : vector<8x128xf32>
    %62 = arith.select %59, %57, %61 : vector<8x128xi1>, vector<8x128xf32>
    %63 = vector.extract_strided_slice %62 {offsets = [0, 0], sizes = [1, 128], strides = [1, 1]} : vector<8x128xf32> to vector<1x128xf32>
    %c0_54 = arith.constant 0 : index
    %c128_55 = arith.constant 128 : index
    %64 = vector.load %arg8[%c0_54, %c128_55] : memref<5x256xf32, #tpu.memory_space<vmem>>, vector<1x128xf32>
    tpu.vector_store %arg8[%c0_54, %c128_55], %63 {strides = array<i32>} : memref<5x256xf32, #tpu.memory_space<vmem>>, vector<1x128xf32>,
    %65 = vector.extract_strided_slice %62 {offsets = [1, 0], sizes = [1, 128], strides = [1, 1]} : vector<8x128xf32> to vector<1x128xf32>
    %c1_56 = arith.constant 1 : index
    %c0_57 = arith.constant 0 : index
    %66 = vector.load %arg8[%c1_56, %c0_57] : memref<5x256xf32, #tpu.memory_space<vmem>>, vector<1x128xf32>
    tpu.vector_store %arg8[%c1_56, %c0_57], %65 {strides = array<i32>} : memref<5x256xf32, #tpu.memory_space<vmem>>, vector<1x128xf32>,
    %67 = vector.extract_strided_slice %62 {offsets = [2, 0], sizes = [1, 128], strides = [1, 1]} : vector<8x128xf32> to vector<1x128xf32>
    %c1_58 = arith.constant 1 : index
    %c128_59 = arith.constant 128 : index
    %68 = vector.load %arg8[%c1_58, %c128_59] : memref<5x256xf32, #tpu.memory_space<vmem>>, vector<1x128xf32>
    tpu.vector_store %arg8[%c1_58, %c128_59], %67 {strides = array<i32>} : memref<5x256xf32, #tpu.memory_space<vmem>>, vector<1x128xf32>,
    %69 = vector.extract_strided_slice %62 {offsets = [3, 0], sizes = [1, 128], strides = [1, 1]} : vector<8x128xf32> to vector<1x128xf32>
    %c2_60 = arith.constant 2 : index
    %c0_61 = arith.constant 0 : index
    %70 = vector.load %arg8[%c2_60, %c0_61] : memref<5x256xf32, #tpu.memory_space<vmem>>, vector<1x128xf32>
    tpu.vector_store %arg8[%c2_60, %c0_61], %69 {strides = array<i32>} : memref<5x256xf32, #tpu.memory_space<vmem>>, vector<1x128xf32>,
    %71 = vector.extract_strided_slice %62 {offsets = [4, 0], sizes = [1, 128], strides = [1, 1]} : vector<8x128xf32> to vector<1x128xf32>
    %c2_62 = arith.constant 2 : index
    %c128_63 = arith.constant 128 : index
    %72 = vector.load %arg8[%c2_62, %c128_63] : memref<5x256xf32, #tpu.memory_space<vmem>>, vector<1x128xf32>
    tpu.vector_store %arg8[%c2_62, %c128_63], %71 {strides = array<i32>} : memref<5x256xf32, #tpu.memory_space<vmem>>, vector<1x128xf32>,
    %73 = vector.extract_strided_slice %62 {offsets = [5, 0], sizes = [1, 128], strides = [1, 1]} : vector<8x128xf32> to vector<1x128xf32>
    %c3_64 = arith.constant 3 : index
    %c0_65 = arith.constant 0 : index
    %74 = vector.load %arg8[%c3_64, %c0_65] : memref<5x256xf32, #tpu.memory_space<vmem>>, vector<1x128xf32>
    tpu.vector_store %arg8[%c3_64, %c0_65], %73 {strides = array<i32>} : memref<5x256xf32, #tpu.memory_space<vmem>>, vector<1x128xf32>,
    %75 = vector.extract_strided_slice %62 {offsets = [6, 0], sizes = [1, 128], strides = [1, 1]} : vector<8x128xf32> to vector<1x128xf32>
    %c3_66 = arith.constant 3 : index
    %c128_67 = arith.constant 128 : index
    %76 = vector.load %arg8[%c3_66, %c128_67] : memref<5x256xf32, #tpu.memory_space<vmem>>, vector<1x128xf32>
    tpu.vector_store %arg8[%c3_66, %c128_67], %75 {strides = array<i32>} : memref<5x256xf32, #tpu.memory_space<vmem>>, vector<1x128xf32>,
    %77 = vector.extract_strided_slice %62 {offsets = [7, 0], sizes = [1, 128], strides = [1, 1]} : vector<8x128xf32> to vector<1x128xf32>
    %c4_68 = arith.constant 4 : index
    %c0_69 = arith.constant 0 : index
    %78 = vector.load %arg8[%c4_68, %c0_69] : memref<5x256xf32, #tpu.memory_space<vmem>>, vector<1x128xf32>
    tpu.vector_store %arg8[%c4_68, %c0_69], %77 {strides = array<i32>} : memref<5x256xf32, #tpu.memory_space<vmem>>, vector<1x128xf32>,
    %c0_70 = arith.constant 0 : index
    %c0_71 = arith.constant 0 : index
    %79 = vector.load %arg8[%c0_70, %c0_71] : memref<5x256xf32, #tpu.memory_space<vmem>>, vector<4x256xf32>
    %c1_72 = arith.constant 1 : index
    %c0_73 = arith.constant 0 : index
    %80 = vector.load %arg8[%c1_72, %c0_73] : memref<5x256xf32, #tpu.memory_space<vmem>>, vector<4x256xf32>
    %cst_74 = arith.constant dense<0.000000e+00> : vector<4x128xf32>
    %81 = tpu.matmul %79, %4, %cst_74 {dimension_numbers = #tpu.dot_dimension_numbers<[1], [0], [0], [1], [0, 0, 1, 1], [], []>} : vector<4x256xf32>, vector<256x128xf32>, vector<4x128xf32> -> vector<4x128xf32>
    %cst_75 = arith.constant dense<0.000000e+00> : vector<4x128xf32>
    %82 = tpu.matmul %80, %5, %cst_75 {dimension_numbers = #tpu.dot_dimension_numbers<[1], [0], [0], [1], [0, 0, 1, 1], [], []>} : vector<4x256xf32>, vector<256x128xf32>, vector<4x128xf32> -> vector<4x128xf32>
    %83 = arith.addf %81, %82 : vector<4x128xf32>
    %cst_76 = arith.constant 0.000000e+00 : f32
    %84 = vector.broadcast %cst_76 : f32 to vector<4x128xf32>
    %85 = arith.cmpf oge, %83, %84 : vector<4x128xf32>
    %cst_77 = arith.constant 2.000000e-02 : f32
    %86 = vector.broadcast %cst_77 : f32 to vector<4x128xf32>
    %87 = arith.mulf %86, %83 : vector<4x128xf32>
    %88 = arith.select %85, %83, %87 : vector<4x128xi1>, vector<4x128xf32>
    %89 = arith.mulf %88, %6 : vector<4x128xf32>
    %cst_78 = arith.constant dense<0.000000e+00> : vector<4xf32>
    %90 = vector.multi_reduction <add>, %89, %cst_78 [1] : vector<4x128xf32> to vector<4xf32>
    %91 = vector.shape_cast %90 : vector<4xf32> to vector<4x1xf32>
    %cst_79 = arith.constant dense<0.000000e+00> : vector<1xf32>
    %92 = vector.multi_reduction <add>, %91, %cst_79 [0] : vector<4x1xf32> to vector<1xf32>
    %93 = vector.shape_cast %92 : vector<1xf32> to vector<1x1xf32>
    %c1_80 = arith.constant 1 : index
    %c0_81 = arith.constant 0 : index
    %94 = vector.load %arg7[%c1_80, %c0_81] : memref<2x1xf32, #tpu.memory_space<vmem>>, vector<1x1xf32>
    tpu.vector_store %arg7[%c1_80, %c0_81], %93 {strides = array<i32>} : memref<2x1xf32, #tpu.memory_space<vmem>>, vector<1x1xf32>,
    return
  }
  func.func @transform_0(%arg0: i32) -> (i32, i32, i32) {
    %c0_i32 = arith.constant 0 : i32
    %c0_i32_0 = arith.constant 0 : i32
    %c0_i32_1 = arith.constant 0 : i32
    %c0_i32_2 = arith.constant 0 : i32
    return %c0_i32, %c0_i32_0, %c0_i32_1 : i32, i32, i32
  }
  func.func @transform_1(%arg0: i32) -> (i32, i32) {
    %c0_i32 = arith.constant 0 : i32
    %c0_i32_0 = arith.constant 0 : i32
    %c0_i32_1 = arith.constant 0 : i32
    return %c0_i32, %c0_i32_0 : i32, i32
  }
  func.func @transform_2(%arg0: i32) -> (i32, i32) {
    %c0_i32 = arith.constant 0 : i32
    %c0_i32_0 = arith.constant 0 : i32
    %c0_i32_1 = arith.constant 0 : i32
    return %c0_i32, %c0_i32_0 : i32, i32
  }
  func.func @transform_3(%arg0: i32) -> (i32, i32) {
    %c0_i32 = arith.constant 0 : i32
    %c0_i32_0 = arith.constant 0 : i32
    %c0_i32_1 = arith.constant 0 : i32
    return %c0_i32, %c0_i32_0 : i32, i32
  }
  func.func @transform_4(%arg0: i32) -> (i32, i32) {
    %c0_i32 = arith.constant 0 : i32
    %c0_i32_0 = arith.constant 0 : i32
    %c0_i32_1 = arith.constant 0 : i32
    return %c0_i32, %c0_i32_0 : i32, i32
  }
  func.func @transform_5(%arg0: i32) -> (i32, i32) {
    %c0_i32 = arith.constant 0 : i32
    %c0_i32_0 = arith.constant 0 : i32
    %c0_i32_1 = arith.constant 0 : i32
    return %c0_i32, %c0_i32_0 : i32, i32
  }
  func.func @transform_6(%arg0: i32) -> (i32, i32) {
    %c0_i32 = arith.constant 0 : i32
    %c0_i32_0 = arith.constant 0 : i32
    %c0_i32_1 = arith.constant 0 : i32
    return %c0_i32, %c0_i32_0 : i32, i32
  }
}

</mosaic_0001>

<bundles_post_ra>
// kernel: _lambda_.1
= control target key start
LH: loop header
LB: loop body
LE: loop exit
PB: predicated region body
PF: predicated region fallthrough
CT: control target
= control target key end

     0   :  { %v1376_v0 = vmov 0.0|0.0   ;;  %v1377_v4 = vmov 0.0   ;;  %vm1378_vm0 = vmmov 0   ;;  %vm444_vm4 = vcmask 1043456   ;;  %s1929_s2 = inlined_call_operand.vmem [shape: f32[128,128], index: 2, kind: input, shape index: {}]   ;;  %s1930_s4 = inlined_call_operand.vmem [shape: f32[256,128], index: 4, kind: input, shape index: {}]   ;;  %s1931_s1 = inlined_call_operand.vmem [shape: f32[128,128], index: 1, kind: input, shape index: {}]   ;;  %s1932_s0 = inlined_call_operand.vmem [shape: f32[2,9,128], index: 0, kind: input, shape index: {}]   ;;  %s1933_s3 = inlined_call_operand.vmem [shape: f32[256,128], index: 3, kind: input, shape index: {}]   ;;  %s1934_s5 = inlined_call_operand.vmem [shape: f32[4,128], index: 5, kind: input, shape index: {}]   ;;  %s1935_s6 = inlined_call_operand.vmem [shape: f32[2,1], index: 6, kind: output, shape index: {}]  }
   0x1   :  { %1145 = vmatprep.subr.bf16.mxu0 %v1376_v0  ;;  %v41_v1 = vld [vmem:[%s1929_s2] sm:$0xff]  ;;  %v42_v2 = vld [vmem:[%s1929_s2 + $0x8] sm:$0xff]  ;;  %v43_v3 = vld [vmem:[%s1929_s2 + $0x10] sm:$0xff]  ;;  %23 = vst [vmem:[#allocation2] sm:$0x1f] %v1377_v4  ;;  %1037 = vmatprep.mubr.msk.f32.mxu0 %vm1378_vm0, %v1377_v4  ;;  %vm455_vm6 = vcmask 0  }
   0x2   :  { %24 = vst [vmem:[#allocation2 + $0x8] sm:$0x1f] %v1377_v4  ;;  %v1428_v5 = vpack.c.bf16 %v42_v2, %v41_v1  ;;  %v44_v6 = vld [vmem:[%s1929_s2 + $0x18] sm:$0xff]  ;;  %v45_v8 = vld [vmem:[%s1929_s2 + $0x20] sm:$0xff]  ;;  %v46_v9 = vld [vmem:[%s1929_s2 + $0x28] sm:$0xff] }
   0x3   :  { %v1434_v7 = vpack.c.bf16 %v44_v6, %v43_v3  ;;  %v1444_v10 = vpack.c.bf16 %v46_v9, %v45_v8  ;;  %v47_v11 = vld [vmem:[%s1929_s2 + $0x30] sm:$0xff]  ;;  %v48_v12 = vld [vmem:[%s1929_s2 + $0x38] sm:$0xff]  ;;  %v49_v14 = vld [vmem:[%s1929_s2 + $0x40] sm:$0xff] }
   0x4   :  { %1147 = vmatpush3.bf16.msra.mxu0 %v1428_v5  ;;  %v1454_v13 = vpack.c.bf16 %v48_v12, %v47_v11  ;;  %v50_v15 = vld [vmem:[%s1929_s2 + $0x48] sm:$0xff]  ;;  %v105_v16 = vld [vmem:[%s1930_s4 + $0x80] sm:$0xff]  ;;  %v107_v21 = vld [vmem:[%s1930_s4 + $0x90] sm:$0xff] }
   0x5   :  { %1148 = vmatprep.subr.bf16.mxu0 %v1376_v0  ;;  %v106_v17 = vld [vmem:[%s1930_s4 + $0x88] sm:$0xff]  ;;  %v89_v18 = vld [vmem:[%s1930_s4] sm:$0xff]  ;;  %v108_v22 = vld [vmem:[%s1930_s4 + $0x98] sm:$0xff]  ;;  %v1497_v28 = vpack.c.bf16 %v50_v15, %v49_v14 }
   0x6   :  { %v1472_v19 = vpack.c.bf16 %v106_v17, %v105_v16  ;;  %v90_v20 = vld [vmem:[%s1930_s4 + $0x8] sm:$0xff]  ;;  %v1485_v24 = vpack.c.bf16 %v108_v22, %v107_v21  ;;  %v91_v25 = vld [vmem:[%s1930_s4 + $0x10] sm:$0xff]  ;;  %v92_v26 = vld [vmem:[%s1930_s4 + $0x18] sm:$0xff] }
   0x7   :  { %v1483_v23 = vpack.c.bf16 %v90_v20, %v89_v18  ;;  %v109_v27 = vld [vmem:[%s1930_s4 + $0xa0] sm:$0xff]  ;;  %v110_v29 = vld [vmem:[%s1930_s4 + $0xa8] sm:$0xff]  ;;  %v51_v30 = vld [vmem:[%s1929_s2 + $0x50] sm:$0xff]  ;;  %v1511_v32 = vpack.c.bf16 %v92_v26, %v91_v25 }
   0x8   :  { %1150 = vmatpush3.bf16.msra.mxu0 %v1434_v7  ;;  %1194 = vmatprep.subr.bf16.mxu1 %v1472_v19  ;;  %v52_v31 = vld [vmem:[%s1929_s2 + $0x58] sm:$0xff]  ;;  %v1514_v33 = vpack.c.bf16 %v110_v29, %v109_v27  ;;  %v93_v34 = vld [vmem:[%s1930_s4 + $0x20] sm:$0xff]  ;;  %v94_v35 = vld [vmem:[%s1930_s4 + $0x28] sm:$0xff] }
   0x9   :  { %1151 = vmatprep.subr.bf16.mxu0 %v1376_v0  ;;  %1196 = vmatpush3.bf16.msra.mxu1 %v1483_v23  ;;  %v111_v36 = vld [vmem:[%s1930_s4 + $0xb0] sm:$0xff]  ;;  %v112_v37 = vld [vmem:[%s1930_s4 + $0xb8] sm:$0xff]  ;;  %v1529_v38 = vpack.c.bf16 %v52_v31, %v51_v30  ;;  %v53_v39 = vld [vmem:[%s1929_s2 + $0x60] sm:$0xff]  ;;  %v1539_v41 = vpack.c.bf16 %v94_v35, %v93_v34 }
   0xa   :  { %1198 = vmatprep.subr.bf16.mxu1 %v1485_v24  ;;  %v54_v40 = vld [vmem:[%s1929_s2 + $0x68] sm:$0xff]  ;;  %v1542_v42 = vpack.c.bf16 %v112_v37, %v111_v36  ;;  %v95_v43 = vld [vmem:[%s1930_s4 + $0x30] sm:$0xff]  ;;  %v96_v44 = vld [vmem:[%s1930_s4 + $0x38] sm:$0xff] }
   0xb   :  { %v1551_v45 = vpack.c.bf16 %v54_v40, %v53_v39  ;;  %v55_v46 = vld [vmem:[%s1929_s2 + $0x70] sm:$0xff]  ;;  %v56_v47 = vld [vmem:[%s1929_s2 + $0x78] sm:$0xff]  ;;  %v1561_v48 = vpack.c.bf16 %v96_v44, %v95_v43  ;;  %v25_v50 = vld [vmem:[%s1931_s1] sm:$0xff] }
   0xc   :  { %1153 = vmatpush3.bf16.msra.mxu0 %v1444_v10  ;;  %v1565_v49 = vpack.c.bf16 %v56_v47, %v55_v46  ;;  %v26_v51 = vld [vmem:[%s1931_s1 + $0x8] sm:$0xff]  ;;  %v27_v54 = vld [vmem:[%s1931_s1 + $0x10] sm:$0xff]  ;;  %v28_v55 = vld [vmem:[%s1931_s1 + $0x18] sm:$0xff] }
   0xd   :  { %1154 = vmatprep.subr.bf16.mxu0 %v1376_v0  ;;  %1200 = vmatpush3.bf16.msra.mxu1 %v1511_v32  ;;  %v123_v52 = vld [vmem:[%s1932_s0 + $0x1] sm:$0xff]  ;;  %v1170_v53 = vpack.c.bf16 %v26_v51, %v25_v50  ;;  %v1173_v56 = vpack.c.bf16 %v28_v55, %v27_v54  ;;  %v31_v60 = vld [vmem:[%s1931_s1 + $0x30] sm:$0xff]  ;;  %v32_v61 = vld [vmem:[%s1931_s1 + $0x38] sm:$0xff] }
   0xe   :  { %1202 = vmatprep.subr.bf16.mxu1 %v1514_v33  ;;  %v29_v57 = vld [vmem:[%s1931_s1 + $0x20] sm:$0xff]  ;;  %v30_v58 = vld [vmem:[%s1931_s1 + $0x28] sm:$0xff]  ;;  %v1179_v62 = vpack.c.bf16 %v32_v61, %v31_v60  ;;  %v35_v3 = vld [vmem:[%s1931_s1 + $0x50] sm:$0xff] }
   0xf   :  { %v1176_v59 = vpack.c.bf16 %v30_v58, %v29_v57  ;;  %v33_v63 = vld [vmem:[%s1931_s1 + $0x40] sm:$0xff]  ;;  %v34_v1 = vld [vmem:[%s1931_s1 + $0x48] sm:$0xff]  ;;  %v36_v6 = vld [vmem:[%s1931_s1 + $0x58] sm:$0xff] }
  0x10   :  { %1156 = vmatpush3.bf16.msra.mxu0 %v1454_v13  ;;  %v1182_v2 = vpack.c.bf16 %v34_v1, %v33_v63  ;;  %v1185_v8 = vpack.c.bf16 %v36_v6, %v35_v3  ;;  %v37_v9 = vld [vmem:[%s1931_s1 + $0x60] sm:$0xff]  ;;  %v38_v11 = vld [vmem:[%s1931_s1 + $0x68] sm:$0xff]  ;;  %v39_v14 = vld [vmem:[%s1931_s1 + $0x70] sm:$0xff] }
  0x11   :  { %1157 = vmatprep.subr.bf16.mxu0 %v1376_v0  ;;  %1204 = vmatpush3.bf16.msra.mxu1 %v1539_v41  ;;  %v1188_v12 = vpack.c.bf16 %v38_v11, %v37_v9  ;;  %v40_v15 = vld [vmem:[%s1931_s1 + $0x78] sm:$0xff]  ;;  %v122_v17 = vld [vmem:[%s1932_s0] sm:$0xff]  ;;  %v98_v18 = vld [vmem:[%s1930_s4 + $0x48] sm:$0xff] }
  0x12   :  { %1206 = vmatprep.subr.bf16.mxu1 %v1542_v42  ;;  %v1191_v16 = vpack.c.bf16 %v40_v15, %v39_v14  ;;  %v115_v21 = vld [vmem:[%s1930_s4 + $0xd0] sm:$0xff]  ;;  %v116_v22 = vld [vmem:[%s1930_s4 + $0xd8] sm:$0xff]  ;;  %v117_v29 = vld [vmem:[%s1930_s4 + $0xe0] sm:$0xff] }
  0x13   :  { %v1692_v25 = vpack.c.bf16 %v116_v22, %v115_v21  ;;  %v99_v26 = vld [vmem:[%s1930_s4 + $0x50] sm:$0xff]  ;;  %v100_v27 = vld [vmem:[%s1930_s4 + $0x58] sm:$0xff]  ;;  %v118_v30 = vld [vmem:[%s1930_s4 + $0xe8] sm:$0xff] }
  0x14   :  { %1159 = vmatpush3.bf16.msra.mxu0 %v1497_v28  ;;  %v1710_v31 = vpack.c.bf16 %v118_v30, %v117_v29  ;;  %v101_v34 = vld [vmem:[%s1930_s4 + $0x60] sm:$0xff]  ;;  %v102_v35 = vld [vmem:[%s1930_s4 + $0x68] sm:$0xff]  ;;  %v119_v36 = vld [vmem:[%s1930_s4 + $0xf0] sm:$0xff] }
  0x15   :  { %1160 = vmatprep.subr.bf16.mxu0 %v1376_v0  ;;  %1208 = vmatpush3.bf16.msra.mxu1 %v1561_v48  ;;  %v1721_v37 = vpack.c.bf16 %v102_v35, %v101_v34  ;;  %v103_v39 = vld [vmem:[%s1930_s4 + $0x70] sm:$0xff]  ;;  %v104_v40 = vld [vmem:[%s1930_s4 + $0x78] sm:$0xff]  ;;  %v74_v46 = vld [vmem:[%s1933_s3 + $0x88] sm:$0xff] }
  0x16   :  { %v1736_v44 = vpack.c.bf16 %v104_v40, %v103_v39  ;;  %v57_v60 = vld [vmem:[%s1933_s3] sm:$0xff]  ;;  %v58_v61 = vld [vmem:[%s1933_s3 + $0x8] sm:$0xff]  ;;  %v76_v63 = vld [vmem:[%s1933_s3 + $0x98] sm:$0xff] }
  0x17   :  { %v59_v11 = vld [vmem:[%s1933_s3 + $0x10] sm:$0xff]  ;;  %v77_v14 = vld [vmem:[%s1933_s3 + $0xa0] sm:$0xff]  ;;  %v78_v15 = vld [vmem:[%s1933_s3 + $0xa8] sm:$0xff] }
  0x18   :  { %1162 = vmatpush3.bf16.msra.mxu0 %v1529_v38  ;;  %v63_v22 = vld [vmem:[%s1933_s3 + $0x30] sm:$0xff]  ;;  %v82_v29 = vld [vmem:[%s1933_s3 + $0xc8] sm:$0xff]  ;;  %v65_v35 = vld [vmem:[%s1933_s3 + $0x40] sm:$0xff] }
  0x19   :  { %1163 = vmatprep.subr.bf16.mxu0 %v1376_v0  ;;  %v84_v39 = vld [vmem:[%s1933_s3 + $0xd8] sm:$0xff] }
  0x1c   :  { %1165 = vmatpush3.bf16.msra.mxu0 %v1551_v45 }
  0x1d   :  { %1166 = vmatprep.subr.bf16.mxu0 %v1376_v0 }
  0x20   :  { %1168 = vmatpush3.bf16.msra.mxu0 %v1565_v49 }
  0x21   :  { %1169 = vmatprep.subr.bf16.mxu0 %v1376_v0 }
  0x23   :  { %1038 = vmatmul.mubr.f32.vlgmr.msra.gmra.mrb[0].mxu0 %v123_v52 }
  0x24   :  { %1171 = vmatpush3.bf16.msra.mxu0 %v1170_v53  ;;  %1072 = vmatprep.mubr.msk.f32.mxu0 %vm1378_vm0, %v1377_v4 }
  0x25   :  { %1172 = vmatprep.subr.bf16.mxu0 %v1376_v0 }
  0x28   :  { %1174 = vmatpush3.bf16.msra.mxu0 %v1173_v56 }
  0x29   :  { %1175 = vmatprep.subr.bf16.mxu0 %v1376_v0 }
  0x2c   :  { %1177 = vmatpush3.bf16.msra.mxu0 %v1176_v59 }
  0x2d   :  { %1178 = vmatprep.subr.bf16.mxu0 %v1376_v0 }
  0x30   :  { %1180 = vmatpush3.bf16.msra.mxu0 %v1179_v62 }
  0x31   :  { %1181 = vmatprep.subr.bf16.mxu0 %v1376_v0 }
  0x34   :  { %1183 = vmatpush3.bf16.msra.mxu0 %v1182_v2 }
  0x35   :  { %1184 = vmatprep.subr.bf16.mxu0 %v1376_v0 }
  0x38   :  { %1186 = vmatpush3.bf16.msra.mxu0 %v1185_v8 }
  0x39   :  { %1187 = vmatprep.subr.bf16.mxu0 %v1376_v0 }
  0x3c   :  { %1189 = vmatpush3.bf16.msra.mxu0 %v1188_v12 }
  0x3d   :  { %1190 = vmatprep.subr.bf16.mxu0 %v1376_v0 }
  0x40   :  { %1192 = vmatpush3.bf16.msra.mxu0 %v1191_v16 }
  0x41   :  { %1257 = vmatprep.subr.bf16.mxu0 %v1376_v0 }
  0x43   :  { %1073 = vmatmul.mubr.f32.vlgmr.msra.gmra.mrb[0].mxu0 %v122_v17 }
  0x44   :  { %1259 = vmatpush3.bf16.msra.mxu0 %v1428_v5  ;;  %1107 = vmatprep.mubr.msk.f32.mxu0 %vm1378_vm0, %v1377_v4  ;;  %v796_v5 = vld [vmem:[%s1932_s0 + $0x11] sm:$0xff] }
  0x45   :  { %1260 = vmatprep.subr.bf16.mxu0 %v1376_v0 }
  0x48   :  { %1262 = vmatpush3.bf16.msra.mxu0 %v1434_v7  ;;  %v113_v7 = vld [vmem:[%s1930_s4 + $0xc0] sm:$0xff] }
  0x49   :  { %1263 = vmatprep.subr.bf16.mxu0 %v1376_v0 }
  0x4c   :  { %1265 = vmatpush3.bf16.msra.mxu0 %v1444_v10  ;;  %v114_v10 = vld [vmem:[%s1930_s4 + $0xc8] sm:$0xff] }
  0x4d   :  { %1266 = vmatprep.subr.bf16.mxu0 %v1376_v0 }
  0x50   :  { %1268 = vmatpush3.bf16.msra.mxu0 %v1454_v13  ;;  %v1674_v13 = vpack.c.bf16 %v114_v10, %v113_v7  ;;  %v62_v7 = vld [vmem:[%s1933_s3 + $0x28] sm:$0xff]  ;;  %v79_v10 = vld [vmem:[%s1933_s3 + $0xb0] sm:$0xff] }
  0x51   :  { %1269 = vmatprep.subr.bf16.mxu0 %v1376_v0 }
  0x52   :  { %1210 = vmatprep.subr.bf16.mxu1 %v1674_v13 }
  0x54   :  { %1271 = vmatpush3.bf16.msra.mxu0 %v1497_v28  ;;  %v1700_v28 = vpack.c.bf16 %v100_v27, %v99_v26  ;;  %v64_v26 = vld [vmem:[%s1933_s3 + $0x38] sm:$0xff]  ;;  %v81_v27 = vld [vmem:[%s1933_s3 + $0xc0] sm:$0xff] }
  0x55   :  { %1272 = vmatprep.subr.bf16.mxu0 %v1376_v0  ;;  %v1814_v30 = vpack.c.bf16 %v64_v26, %v63_v22  ;;  %v1817_v34 = vpack.c.bf16 %v82_v29, %v81_v27 }
  0x58   :  { %1274 = vmatpush3.bf16.msra.mxu0 %v1529_v38  ;;  %v120_v38 = vld [vmem:[%s1930_s4 + $0xf8] sm:$0xff] }
  0x59   :  { %1275 = vmatprep.subr.bf16.mxu0 %v1376_v0  ;;  %v1733_v43 = vpack.c.bf16 %v120_v38, %v119_v36  ;;  %v66_v36 = vld [vmem:[%s1933_s3 + $0x48] sm:$0xff]  ;;  %v83_v38 = vld [vmem:[%s1933_s3 + $0xd0] sm:$0xff] }
  0x5a   :  { %v1832_v40 = vpack.c.bf16 %v66_v36, %v65_v35 }
  0x5c   :  { %1277 = vmatpush3.bf16.msra.mxu0 %v1551_v45  ;;  %v73_v45 = vld [vmem:[%s1933_s3 + $0x80] sm:$0xff] }
  0x5d   :  { %1278 = vmatprep.subr.bf16.mxu0 %v1376_v0  ;;  %v1746_v47 = vpack.c.bf16 %v74_v46, %v73_v45  ;;  %v1835_v45 = vpack.c.bf16 %v84_v39, %v83_v38  ;;  %v67_v46 = vld [vmem:[%s1933_s3 + $0x50] sm:$0xff] }
  0x60   :  { %1280 = vmatpush3.bf16.msra.mxu0 %v1565_v49 }
  0x61   :  { %1281 = vmatprep.subr.bf16.mxu0 %v1376_v0 }
  0x63   :  { %1108 = vmatmul.mubr.f32.vlgmr.msra.gmra.mrb[2].mxu0 %v796_v5  ;;  %v1781_v5 = vpack.c.bf16 %v78_v15, %v77_v14  ;;  %v121_v14 = vld [vmem:[%s1934_s5] sm:$0xf] }
  0x64   :  { %1283 = vmatpush3.bf16.msra.mxu0 %v1170_v53  ;;  %1142 = vmatprep.mubr.msk.f32.mxu0 %vm1378_vm0, %v1377_v4  ;;  %v795_v4 = vld [vmem:[%s1932_s0 + $0x10] sm:$0xff] }
  0x65   :  { %1284 = vmatprep.subr.bf16.mxu0 %v1376_v0 }
  0x68   :  { %1286 = vmatpush3.bf16.msra.mxu0 %v1173_v56 }
  0x69   :  { %1287 = vmatprep.subr.bf16.mxu0 %v1376_v0 }
  0x6c   :  { %1289 = vmatpush3.bf16.msra.mxu0 %v1176_v59 }
  0x6d   :  { %1290 = vmatprep.subr.bf16.mxu0 %v1376_v0 }
  0x70   :  { %1292 = vmatpush3.bf16.msra.mxu0 %v1179_v62  ;;  %v75_v62 = vld [vmem:[%s1933_s3 + $0x90] sm:$0xff] }
  0x71   :  { %1293 = vmatprep.subr.bf16.mxu0 %v1376_v0  ;;  %v1763_v9 = vpack.c.bf16 %v76_v63, %v75_v62 }
  0x74   :  { %1295 = vmatpush3.bf16.msra.mxu0 %v1182_v2 }
  0x75   :  { %1296 = vmatprep.subr.bf16.mxu0 %v1376_v0 }
  0x78   :  { %1298 = vmatpush3.bf16.msra.mxu0 %v1185_v8  ;;  %v1761_v8 = vpack.c.bf16 %v58_v61, %v57_v60  ;;  %v71_v60 = vld [vmem:[%s1933_s3 + $0x70] sm:$0xff]  ;;  %v72_v61 = vld [vmem:[%s1933_s3 + $0x78] sm:$0xff] }
  0x79   :  { %1299 = vmatprep.subr.bf16.mxu0 %v1376_v0  ;;  %v1880_v62 = vpack.c.bf16 %v72_v61, %v71_v60 }
  0x7c   :  { %1301 = vmatpush3.bf16.msra.mxu0 %v1188_v12  ;;  %v60_v12 = vld [vmem:[%s1933_s3 + $0x18] sm:$0xff] }
  0x7d   :  { %1302 = vmatprep.subr.bf16.mxu0 %v1376_v0  ;;  %v97_v0 = vld [vmem:[%s1930_s4 + $0x40] sm:$0xff]  ;;  %v1778_v17 = vpack.c.bf16 %v60_v12, %v59_v11 }
  0x7e   :  { %v1682_v20 = vpack.c.bf16 %v98_v18, %v97_v0  ;;  %v80_v0 = vld [vmem:[%s1933_s3 + $0xb8] sm:$0xff] }
  0x7f   :  { %v1799_v21 = vpack.c.bf16 %v80_v0, %v79_v10 }
  0x80   :  { %1304 = vmatpush3.bf16.msra.mxu0 %v1191_v16  ;;  %1212 = vmatpush3.bf16.msra.mxu1 %v1682_v20 }
  0x81   :  { %1214 = vmatprep.subr.bf16.mxu1 %v1692_v25 }
  0x83   :  { %1143 = vmatmul.mubr.f32.vlgmr.msra.gmra.mrb[2].mxu0 %v795_v4  ;;  %v61_v4 = vld [vmem:[%s1933_s3 + $0x20] sm:$0xff] }
  0x84   :  { %1216 = vmatpush3.bf16.msra.mxu1 %v1700_v28  ;;  %v1796_v18 = vpack.c.bf16 %v62_v7, %v61_v4 }
  0x85   :  { %1218 = vmatprep.subr.bf16.mxu1 %v1710_v31 }
  0x88   :  { %1220 = vmatpush3.bf16.msra.mxu1 %v1721_v37 }
  0x89   :  { %1222 = vmatprep.subr.bf16.mxu1 %v1733_v43 }
  0x8c   :  { %1224 = vmatpush3.bf16.msra.mxu1 %v1736_v44 }
  0x8d   :  { %1226 = vmatprep.subr.bf16.mxu1 %v1746_v47 }
 0x116   :  { %v260_v49 = vpop.f32.mrb[0].mxu0 }
 0x117   :  { %vm264_vm1 = vcmp.ge.f32.partialorder %v260_v49, 0.0  ;;  %v265_v50 = vmul.f32 0.02, %v260_v49  ;;  %v1074_v51 = vpop.f32.mrb[1].mxu0 }
 0x118   :  { %v86_v51 = vld [vmem:[%s1933_s3 + $0xe8] sm:$0xff] }
 0x119   :  { %v266_v52 = vsel %vm264_vm1, %v260_v49, %v265_v50  ;;  %v68_v49 = vld [vmem:[%s1933_s3 + $0x58] sm:$0xff]  ;;  %v85_v50 = vld [vmem:[%s1933_s3 + $0xe0] sm:$0xff] }
 0x11a   :  { %267 = vst [vmem:[#allocation2 + $0x8] sm:$0x1] %v266_v52  ;;  %v269_v53 = vrot.slane %v266_v52, 1  ;;  %v272_v54 = vrot.slane %v266_v52, 2  ;;  %v275_v55 = vrot.slane %v266_v52, 3  ;;  %v278_v56 = vrot.slane %v266_v52, 4 }
 0x11b   :  { %v281_v57 = vrot.slane %v266_v52, 5  ;;  %v284_v58 = vrot.slane %v266_v52, 6  ;;  %v287_v59 = vrot.slane %v266_v52, 7  ;;  %v1850_v52 = vpack.c.bf16 %v68_v49, %v67_v46 }
 0x11c   :  { %271 = vst [vmem:[#allocation2 + $0x1] sm:$0x1] %v269_v53  ;;  %274 = vst [vmem:[#allocation2 + $0x9] sm:$0x1] %v272_v54  ;;  %v1853_v53 = vpack.c.bf16 %v86_v51, %v85_v50  ;;  %v69_v54 = vld [vmem:[%s1933_s3 + $0x60] sm:$0xff] }
 0x11d   :  { %277 = vst [vmem:[#allocation2 + $0x2] sm:$0x1] %v275_v55  ;;  %280 = vst [vmem:[#allocation2 + $0xa] sm:$0x1] %v278_v56  ;;  %v70_v55 = vld [vmem:[%s1933_s3 + $0x68] sm:$0xff]  ;;  %v87_v56 = vld [vmem:[%s1933_s3 + $0xf0] sm:$0xff] }
 0x11e   :  { %283 = vst [vmem:[#allocation2 + $0x3] sm:$0x1] %v281_v57  ;;  %286 = vst [vmem:[#allocation2 + $0xb] sm:$0x1] %v284_v58  ;;  %v88_v57 = vld [vmem:[%s1933_s3 + $0xf8] sm:$0xff]  ;;  %v1868_v58 = vpack.c.bf16 %v70_v55, %v69_v54 }
 0x11f   :  { %289 = vst [vmem:[#allocation2 + $0x4] sm:$0x1] %v287_v59  ;;  %v1871_v59 = vpack.c.bf16 %v88_v57, %v87_v56 }
 0x125   :  { %v293_v1 = vld [vmem:[#allocation2 + $0x8] sm:$0x1e]  ;;  %v290_v63 = vld [vmem:[#allocation2] sm:$0xf] }
 0x126   :  { %v292_v2 = vld [vmem:[#allocation2] sm:$0x1e]  ;;  %v297_v3 = vrot.slane %v293_v1, 1  ;;  %v291_v16 = vld [vmem:[#allocation2 + $0x8] sm:$0xf] }
 0x127   :  { %v296_v6 = vrot.slane %v292_v2, 1 }
 0x128   :  { %364 = vmatprep.mubr.f32.mxu1 %v297_v3 }
 0x129   :  { %365 = vmatmul.mubr.f32.vlgmr.msra.gmra.mrb[0].mxu1 %v296_v6 }
 0x12a   :  { %1228 = vmatpush3.bf16.msra.mxu1 %v1761_v8  ;;  %434 = vmatprep.mubr.f32.mxu1 %v291_v16 }
 0x12b   :  { %1230 = vmatprep.subr.bf16.mxu1 %v1763_v9 }
 0x12e   :  { %1232 = vmatpush3.bf16.msra.mxu1 %v1778_v17 }
 0x12f   :  { %1234 = vmatprep.subr.bf16.mxu1 %v1781_v5 }
 0x132   :  { %1236 = vmatpush3.bf16.msra.mxu1 %v1796_v18 }
 0x133   :  { %1238 = vmatprep.subr.bf16.mxu1 %v1799_v21 }
 0x136   :  { %1240 = vmatpush3.bf16.msra.mxu1 %v1814_v30 }
 0x137   :  { %1242 = vmatprep.subr.bf16.mxu1 %v1817_v34 }
 0x13a   :  { %1244 = vmatpush3.bf16.msra.mxu1 %v1832_v40 }
 0x13b   :  { %1246 = vmatprep.subr.bf16.mxu1 %v1835_v45 }
 0x13e   :  { %1248 = vmatpush3.bf16.msra.mxu1 %v1850_v52 }
 0x13f   :  { %1250 = vmatprep.subr.bf16.mxu1 %v1853_v53 }
 0x142   :  { %1252 = vmatpush3.bf16.msra.mxu1 %v1868_v58 }
 0x143   :  { %1254 = vmatprep.subr.bf16.mxu1 %v1871_v59 }
 0x146   :  { %1256 = vmatpush3.bf16.msra.mxu1 %v1880_v62 }
 0x147   :  { %1306 = vmatprep.subr.bf16.mxu1 %v1472_v19 }
 0x149   :  { %435 = vmatmul.mubr.f32.vlgmr.msra.gmra.mrb[2].mxu1 %v290_v63 }
 0x14a   :  { %1308 = vmatpush3.bf16.msra.mxu1 %v1483_v23 }
 0x14b   :  { %1310 = vmatprep.subr.bf16.mxu1 %v1485_v24 }
 0x14e   :  { %1312 = vmatpush3.bf16.msra.mxu1 %v1511_v32 }
 0x14f   :  { %1314 = vmatprep.subr.bf16.mxu1 %v1514_v33 }
 0x152   :  { %1316 = vmatpush3.bf16.msra.mxu1 %v1539_v41 }
 0x153   :  { %1318 = vmatprep.subr.bf16.mxu1 %v1542_v42 }
 0x156   :  { %1320 = vmatpush3.bf16.msra.mxu1 %v1561_v48  ;;  %v596_v1 = vpop.f32.mrb[2].mxu0 }
 0x157   :  { %1322 = vmatprep.subr.bf16.mxu1 %v1674_v13  ;;  %vm600_vm2 = vcmp.ge.f32.partialorder %v596_v1, 0.0  ;;  %v601_v19 = vmul.f32 0.02, %v596_v1  ;;  %v1144_v2 = vpop.f32.mrb[3].mxu0 }
 0x159   :  { %v602_v3 = vsel %vm600_vm2, %v596_v1, %v601_v19 }
 0x15a   :  { %1324 = vmatpush3.bf16.msra.mxu1 %v1682_v20  ;;  %603 = vst [vmem:[#allocation2 + $0x8] sm:$0x1] %v602_v3  ;;  %v605_v23 = vrot.slane %v602_v3, 1  ;;  %v608_v24 = vrot.slane %v602_v3, 2  ;;  %v611_v32 = vrot.slane %v602_v3, 3  ;;  %v614_v33 = vrot.slane %v602_v3, 4 }
 0x15b   :  { %1326 = vmatprep.subr.bf16.mxu1 %v1692_v25  ;;  %v617_v41 = vrot.slane %v602_v3, 5  ;;  %v620_v42 = vrot.slane %v602_v3, 6  ;;  %v623_v6 = vrot.slane %v602_v3, 7 }
 0x15c   :  { %607 = vst [vmem:[#allocation2 + $0x1] sm:$0x1] %v605_v23  ;;  %610 = vst [vmem:[#allocation2 + $0x9] sm:$0x1] %v608_v24 }
 0x15d   :  { %613 = vst [vmem:[#allocation2 + $0x2] sm:$0x1] %v611_v32  ;;  %616 = vst [vmem:[#allocation2 + $0xa] sm:$0x1] %v614_v33 }
 0x15e   :  { %619 = vst [vmem:[#allocation2 + $0x3] sm:$0x1] %v617_v41  ;;  %622 = vst [vmem:[#allocation2 + $0xb] sm:$0x1] %v620_v42  ;;  %1328 = vmatpush3.bf16.msra.mxu1 %v1700_v28 }
 0x15f   :  { %625 = vst [vmem:[#allocation2 + $0x4] sm:$0x1] %v623_v6  ;;  %1330 = vmatprep.subr.bf16.mxu1 %v1710_v31 }
 0x162   :  { %1332 = vmatpush3.bf16.msra.mxu1 %v1721_v37 }
 0x163   :  { %1334 = vmatprep.subr.bf16.mxu1 %v1733_v43 }
 0x165   :  { %v629_v48 = vld [vmem:[#allocation2 + $0x8] sm:$0x1e]  ;;  %v626_v28 = vld [vmem:[#allocation2] sm:$0xf] }
 0x166   :  { %v628_v13 = vld [vmem:[#allocation2] sm:$0x1e]  ;;  %1336 = vmatpush3.bf16.msra.mxu1 %v1736_v44  ;;  %v633_v20 = vrot.slane %v629_v48, 1  ;;  %v627_v11 = vld [vmem:[#allocation2 + $0x8] sm:$0xf] }
 0x167   :  { %v632_v25 = vrot.slane %v628_v13, 1  ;;  %1338 = vmatprep.subr.bf16.mxu1 %v1746_v47 }
 0x168   :  { %700 = vmatprep.mubr.f32.mxu1 %v633_v20 }
 0x169   :  { %701 = vmatmul.mubr.f32.vlgmr.msra.gmra.mrb[4].mxu1 %v632_v25 }
 0x16a   :  { %1340 = vmatpush3.bf16.msra.mxu1 %v1761_v8  ;;  %770 = vmatprep.mubr.f32.mxu1 %v627_v11 }
 0x16b   :  { %1342 = vmatprep.subr.bf16.mxu1 %v1763_v9 }
 0x16e   :  { %1344 = vmatpush3.bf16.msra.mxu1 %v1778_v17 }
 0x16f   :  { %1346 = vmatprep.subr.bf16.mxu1 %v1781_v5 }
 0x172   :  { %1348 = vmatpush3.bf16.msra.mxu1 %v1796_v18 }
 0x173   :  { %1350 = vmatprep.subr.bf16.mxu1 %v1799_v21 }
 0x176   :  { %1352 = vmatpush3.bf16.msra.mxu1 %v1814_v30 }
 0x177   :  { %1354 = vmatprep.subr.bf16.mxu1 %v1817_v34 }
 0x17a   :  { %1356 = vmatpush3.bf16.msra.mxu1 %v1832_v40 }
 0x17b   :  { %1358 = vmatprep.subr.bf16.mxu1 %v1835_v45 }
 0x17e   :  { %1360 = vmatpush3.bf16.msra.mxu1 %v1850_v52 }
 0x17f   :  { %1362 = vmatprep.subr.bf16.mxu1 %v1853_v53 }
 0x182   :  { %1364 = vmatpush3.bf16.msra.mxu1 %v1868_v58 }
 0x183   :  { %1366 = vmatprep.subr.bf16.mxu1 %v1871_v59 }
 0x186   :  { %1368 = vmatpush3.bf16.msra.mxu1 %v1880_v62 }
 0x189   :  { %771 = vmatmul.mubr.f32.vlgmr.msra.gmra.mrb[6].mxu1 %v626_v28 }
 0x1fc   :  { %v863_v31 = vpop.f32.mrb[0].mxu1 }
 0x1fd   :  { %v864_v37 = vpop.f32.mrb[1].mxu1 }
 0x1fe   :  { %v865_v43 = vadd.f32 %v864_v37, %v863_v31 }
 0x21c   :  { %v898_v44 = vpop.f32.mrb[2].mxu1 }
 0x21d   :  { %v899_v47 = vpop.f32.mrb[3].mxu1 }
 0x21e   :  { %v900_v8 = vadd.f32 %v899_v47, %v898_v44 }
 0x220   :  { %v437_v9 = vadd.f32 %v900_v8, %v865_v43 }
 0x222   :  { %v441_v12 = vmul.f32 0.02, %v437_v9  ;;  %vm440_vm3 = vcmp.ge.f32.partialorder %v437_v9, 0.0 }
 0x224   :  { %v442_v15 = vsel %vm440_vm3, %v437_v9, %v441_v12 }
 0x225   :  { %v443_v16 = vmul.f32 %v442_v15, %v121_v14 }
 0x227   :  { %v445_v17 = vsel %vm444_vm4, %v443_v16, 0.0 }
 0x228   :  { %446 = vadd.xlane.f32.xlu0 %v445_v17 }
 0x23c   :  { %v967_v5 = vpop.f32.mrb[4].mxu1 }
 0x23d   :  { %v968_v4 = vpop.f32.mrb[5].mxu1 }
 0x23e   :  { %v969_v7 = vadd.f32 %v968_v4, %v967_v5 }
 0x25c   :  { %v1002_v10 = vpop.f32.mrb[6].mxu1 }
 0x25d   :  { %v1003_v0 = vpop.f32.mrb[7].mxu1 }
 0x25e   :  { %v1004_v18 = vadd.f32 %v1003_v0, %v1002_v10 }
 0x260   :  { %v773_v21 = vadd.f32 %v1004_v18, %v969_v7 }
 0x262   :  { %v777_v22 = vmul.f32 0.02, %v773_v21  ;;  %vm776_vm5 = vcmp.ge.f32.partialorder %v773_v21, 0.0 }
 0x264   :  { %v778_v26 = vsel %vm776_vm5, %v773_v21, %v777_v22 }
 0x265   :  { %v779_v27 = vmul.f32 %v778_v26, %v121_v14 }
 0x267   :  { %v780_v29 = vsel %vm444_vm4, %v779_v27, 0.0 }
 0x268   :  { %781 = vadd.xlane.f32.xlu0 %v780_v29 }
 0x2b5   :  { %v447_v30 = vpop.xlane.xlu0 %446 }
 0x2b6   :  { %v448_v34 = vsel %vm444_vm4, %v447_v30, 0.0 }
 0x2b7   :  { %v449_v35 = vrot.slane %v448_v34, 4 }
 0x2b9   :  { %v450_v36 = vadd.f32 %v449_v35, %v448_v34 }
 0x2bb   :  { %v451_v38 = vrot.slane %v450_v36, 2 }
 0x2bd   :  { %v452_v39 = vadd.f32 %v451_v38, %v450_v36 }
 0x2bf   :  { %v453_v40 = vrot.slane %v452_v39, 1 }
 0x2c1   :  { %v454_v45 = vadd.f32 %v453_v40, %v452_v39 }
 0x2c3   :  { %456 = vst.msk [vmem:[%s1935_s6] sm:$0x1] %vm455_vm6, %v454_v45 }
 0x2f5   :  { %v782_v46 = vpop.xlane.xlu0 %781 }
 0x2f6   :  { %v783_v49 = vsel %vm444_vm4, %v782_v46, 0.0 }
 0x2f7   :  { %v784_v50 = vrot.slane %v783_v49, 4 }
 0x2f9   :  { %v785_v51 = vadd.f32 %v784_v50, %v783_v49 }
 0x2fb   :  { %v786_v52 = vrot.slane %v785_v51, 2 }
 0x2fd   :  { %v787_v53 = vadd.f32 %v786_v52, %v785_v51 }
 0x2ff   :  { %v788_v54 = vrot.slane %v787_v53, 1 }
 0x301   :  { %v789_v55 = vadd.f32 %v788_v54, %v787_v53 }
 0x303   :  { %790 = vst.msk [vmem:[%s1935_s6 + $0x1] sm:$0x1] %vm455_vm6, %v789_v55 }

</bundles_post_ra>
